<compile_context>
chip_gen: v6e
topology: v6e:2x2x1
jax: 0.10.0
libtpu: 0.0.40
codegen_flags: <defaults>
</compile_context>

<pallas_src>
import jax
import jax.numpy as jnp
from jax import lax
from jax.experimental import pallas as pl
from jax.experimental.pallas import tpu as pltpu


# ----------------------------- kernels ------------------------------------ #

def _eval_kernel(x_ref, med_ref, out_ref):
    # elementwise hot path: x - median (median broadcast over rows)
    out_ref[...] = (x_ref[...] - med_ref[...]).astype(out_ref.dtype)


def _train_kernel(nt_ref, x_ref, med_ref, out_ref, new_med_ref):
    n = x_ref.shape[0]
    k = n // 2                     # 0-indexed rank picked by torch.sort(...)[N//2]

    # Bulk operand hoisted out of the loop (read once); only the compared row
    # is re-fetched from the ref each iteration.
    x = x_ref[...].astype(jnp.float32)

    # --- per-channel k-th order statistic via counting selection ------------
    # cnt[i, ch] = #{ j : x[j, ch] <= x[i, ch] }.  Pure compare+add (VPU) per
    # iteration; the only cross-sublane (XLU) op is the single min-reduce at
    # the end.
    def body(j, cnt):
        row_j = x_ref[pl.ds(j, 1), :].astype(jnp.float32)      # (1, tc)
        return cnt + (row_j <= x).astype(jnp.int32)

    cnt = lax.fori_loop(0, n, body, jnp.zeros(x.shape, jnp.int32),
                        unroll=min(n, 8))   # bounded unroll: LLO visibility w/o spills

    cand = jnp.where(cnt >= k + 1, x, jnp.inf)
    batch_med = jnp.min(cand, axis=0, keepdims=True)           # (1, tc) single XLU reduce

    # --- running-median update + shift --------------------------------------
    nt = nt_ref[0].astype(jnp.float32)                         # scalar from SMEM prefetch
    new_med = (med_ref[...].astype(jnp.float32) * nt + batch_med) / (nt + 1.0)
    new_med_ref[...] = new_med.astype(new_med_ref.dtype)
    out_ref[...] = (x - new_med).astype(out_ref.dtype)


# ----------------------------- tiling helpers ------------------------------ #

def _row_tile(n, cap=512):
    """Largest power-of-two multiple of 8 dividing n (capped); full n otherwise
    (a full-dim block is always legal)."""
    if n % 8 != 0:
        return n
    best, t = 8, 8
    while t <= min(n, cap):
        if n % t == 0:
            best = t
        t *= 2
    return best


def _chan_tile(c, rows, budget_bytes, min_splits=1):
    """Channel tile.

    * C not a multiple of 128  -> full-C block (legal; masked stores are far
      cheaper than the pad/slice passes they would replace).
    * Otherwise the largest multiple of 128 dividing C such that ~6 f32
      (rows x tc) buffers (double-buffered in/out blocks + cnt accumulator +
      hoisted x value) stay under `budget_bytes`, leaving at least
      `min_splits` grid steps (v7x megacore sharding)."""
    if c % 128 != 0:
        return c
    cap = c if c // min_splits < 128 else c // min_splits
    best, t = 128, 128
    while t <= cap:
        if c % t == 0 and rows * t * 4 * 6 <= budget_bytes:
            best = t
        t += 128
    return best


# ----------------------------- wrappers ------------------------------------ #

def mean_shift_eval(x, median):
    n, c = x.shape
    tr = _row_tile(n)
    tc = _chan_tile(c, tr, budget_bytes=12 << 20)

    # channels outer, rows inner -> median tile index constant across inner
    # steps (not re-DMA'd every grid step).
    return pl.pallas_call(
        _eval_kernel,
        out_shape=jax.ShapeDtypeStruct((n, c), x.dtype),
        grid=(c // tc, n // tr),
        in_specs=[pl.BlockSpec((tr, tc), lambda cj, ri: (ri, cj)),
                  pl.BlockSpec((1, tc), lambda cj, ri: (0, cj))],
        out_specs=pl.BlockSpec((tr, tc), lambda cj, ri: (ri, cj)),
        compiler_params=pltpu.CompilerParams(
            dimension_semantics=("parallel", "parallel"),
            vmem_limit_bytes=24 << 20),
        cost_estimate=pl.CostEstimate(
            flops=n * c,
            transcendentals=0,
            bytes_accessed=(2 * n * c + c) * 4),
    )(x, median)


def mean_shift_train(x, median, num_track):
    n, c = x.shape
    # Ensure >=2 channel splits when possible so the parallel axis can shard
    # across v7x's two TensorCores (harmless on v5e/v6e).
    min_splits = 2 if (c % 128 == 0 and c >= 256) else 1
    tc = _chan_tile(c, n, budget_bytes=12 << 20, min_splits=min_splits)

    out, new_med = pl.pallas_call(
        _train_kernel,
        out_shape=(jax.ShapeDtypeStruct((n, c), x.dtype),
                   jax.ShapeDtypeStruct((1, c), median.dtype)),
        grid_spec=pltpu.PrefetchScalarGridSpec(
            num_scalar_prefetch=1,                       # num_track -> SMEM
            grid=(c // tc,),
            in_specs=[pl.BlockSpec((n, tc), lambda j, nt: (0, j)),
                      pl.BlockSpec((1, tc), lambda j, nt: (0, j))],
            out_specs=[pl.BlockSpec((n, tc), lambda j, nt: (0, j)),
                       pl.BlockSpec((1, tc), lambda j, nt: (0, j))],
        ),
        compiler_params=pltpu.CompilerParams(
            dimension_semantics=("parallel",),
            vmem_limit_bytes=24 << 20),
        cost_estimate=pl.CostEstimate(
            flops=2 * n * n * c + 4 * n * c,             # O(N^2 C) compares+adds
            transcendentals=0,
            bytes_accessed=(2 * n * c + 2 * c) * 4),
    )(num_track, x, median)
    return out, new_med


class MeanShift:
    """JAX/Pallas port of the PyTorch MeanShift module (eager state)."""

    def __init__(self, channels):
        self.channels = channels
        self.median = jnp.zeros((1, channels), jnp.float32)
        self.num_track = jnp.zeros((1,), jnp.int32)   # int32 stands in for LongTensor
        self.training = True

    def __call__(self, x):
        if self.training:
            out, new_med = mean_shift_train(x, self.median, self.num_track)
            self.median = new_med
            self.num_track = self.num_track + 1
            return out
        return mean_shift_eval(x, self.median)


# ----------------------------- reference ----------------------------------- #

def _ref_train(x, median, num_track):
    m = jnp.sort(x, axis=0)[x.shape[0] // 2].reshape(1, -1)
    nt = num_track[0].astype(jnp.float32)
    new_med = (median * nt + m) / (nt + 1.0)
    return x - new_med, new_med


# ------------------------------- main --------------------------------------- #

if __name__ == "__main__":
    key = jax.random.PRNGKey(0)
    N, C = 8, 16
    x = jax.random.normal(key, (N, C), dtype=jnp.float32)

    m = MeanShift(C)

    # training step
    m.training = True
    y_train = jax.block_until_ready(m(x))
    ref_out, ref_med = _ref_train(x, jnp.zeros((1, C), jnp.float32),
                                  jnp.zeros((1,), jnp.int32))
    assert jnp.allclose(y_train, ref_out, atol=1e-5), "train output mismatch"
    assert jnp.allclose(m.median, ref_med, atol=1e-5), "running median mismatch"
    assert int(m.num_track[0]) == 1, "num_track mismatch"

    # eval step (uses updated running median)
    m.training = False
    y_eval = jax.block_until_ready(m(x))
    assert jnp.allclose(y_eval, x - ref_med, atol=1e-5), "eval output mismatch"

    print("KERNEL_OK")
</pallas_src>

<mosaic_0001>
module attributes {stable_mosaic.version = 11 : i64} {
  func.func @_train_kernel(%arg0: i32, %arg1: memref<1xi32, #tpu.memory_space<smem>>, %arg2: memref<8x16xf32, #tpu.memory_space<vmem>>, %arg3: memref<1x16xf32, #tpu.memory_space<vmem>>, %arg4: memref<8x16xf32, #tpu.memory_space<vmem>>, %arg5: memref<1x16xf32, #tpu.memory_space<vmem>>) attributes {dimension_semantics = [#tpu.dimension_semantics<parallel>], iteration_bounds = array<i64: 1>, scalar_prefetch = 1 : i64, scratch_operands = 0 : i64, tpu.core_type = #tpu.core_type<tc>, window_params = [{transform_indices = @transform_0, window_bounds = array<i64: 8, 16>}, {transform_indices = @transform_1, window_bounds = array<i64: 1, 16>}, {transform_indices = @transform_2, window_bounds = array<i64: 8, 16>}, {transform_indices = @transform_3, window_bounds = array<i64: 1, 16>}]} {
    %c0 = arith.constant 0 : index
    %c0_0 = arith.constant 0 : index
    %0 = vector.load %arg2[%c0, %c0_0] : memref<8x16xf32, #tpu.memory_space<vmem>>, vector<8x16xf32>
    %c0_i32 = arith.constant 0 : i32
    %1 = vector.broadcast %c0_i32 : i32 to vector<8x16xi32>
    %c0_i32_1 = arith.constant 0 : i32
    %2 = arith.index_cast %c0_i32_1 : i32 to index
    %c0_2 = arith.constant 0 : index
    %3 = vector.load %arg2[%2, %c0_2] : memref<8x16xf32, #tpu.memory_space<vmem>>, vector<1x16xf32>
    %4 = vector.broadcast %3 : vector<1x16xf32> to vector<8x16xf32>
    %5 = arith.cmpf ole, %4, %0 : vector<8x16xf32>
    %6 = arith.extui %5 : vector<8x16xi1> to vector<8x16xi32>
    %7 = arith.addi %1, %6 : vector<8x16xi32>
    %c1_i32 = arith.constant 1 : i32
    %8 = arith.index_cast %c1_i32 : i32 to index
    %c0_3 = arith.constant 0 : index
    %9 = vector.load %arg2[%8, %c0_3] : memref<8x16xf32, #tpu.memory_space<vmem>>, vector<1x16xf32>
    %10 = vector.broadcast %9 : vector<1x16xf32> to vector<8x16xf32>
    %11 = arith.cmpf ole, %10, %0 : vector<8x16xf32>
    %12 = arith.extui %11 : vector<8x16xi1> to vector<8x16xi32>
    %13 = arith.addi %7, %12 : vector<8x16xi32>
    %c2_i32 = arith.constant 2 : i32
    %14 = arith.index_cast %c2_i32 : i32 to index
    %c0_4 = arith.constant 0 : index
    %15 = vector.load %arg2[%14, %c0_4] : memref<8x16xf32, #tpu.memory_space<vmem>>, vector<1x16xf32>
    %16 = vector.broadcast %15 : vector<1x16xf32> to vector<8x16xf32>
    %17 = arith.cmpf ole, %16, %0 : vector<8x16xf32>
    %18 = arith.extui %17 : vector<8x16xi1> to vector<8x16xi32>
    %19 = arith.addi %13, %18 : vector<8x16xi32>
    %c3_i32 = arith.constant 3 : i32
    %20 = arith.index_cast %c3_i32 : i32 to index
    %c0_5 = arith.constant 0 : index
    %21 = vector.load %arg2[%20, %c0_5] : memref<8x16xf32, #tpu.memory_space<vmem>>, vector<1x16xf32>
    %22 = vector.broadcast %21 : vector<1x16xf32> to vector<8x16xf32>
    %23 = arith.cmpf ole, %22, %0 : vector<8x16xf32>
    %24 = arith.extui %23 : vector<8x16xi1> to vector<8x16xi32>
    %25 = arith.addi %19, %24 : vector<8x16xi32>
    %c4_i32 = arith.constant 4 : i32
    %26 = arith.index_cast %c4_i32 : i32 to index
    %c0_6 = arith.constant 0 : index
    %27 = vector.load %arg2[%26, %c0_6] : memref<8x16xf32, #tpu.memory_space<vmem>>, vector<1x16xf32>
    %28 = vector.broadcast %27 : vector<1x16xf32> to vector<8x16xf32>
    %29 = arith.cmpf ole, %28, %0 : vector<8x16xf32>
    %30 = arith.extui %29 : vector<8x16xi1> to vector<8x16xi32>
    %31 = arith.addi %25, %30 : vector<8x16xi32>
    %c5_i32 = arith.constant 5 : i32
    %32 = arith.index_cast %c5_i32 : i32 to index
    %c0_7 = arith.constant 0 : index
    %33 = vector.load %arg2[%32, %c0_7] : memref<8x16xf32, #tpu.memory_space<vmem>>, vector<1x16xf32>
    %34 = vector.broadcast %33 : vector<1x16xf32> to vector<8x16xf32>
    %35 = arith.cmpf ole, %34, %0 : vector<8x16xf32>
    %36 = arith.extui %35 : vector<8x16xi1> to vector<8x16xi32>
    %37 = arith.addi %31, %36 : vector<8x16xi32>
    %c6_i32 = arith.constant 6 : i32
    %38 = arith.index_cast %c6_i32 : i32 to index
    %c0_8 = arith.constant 0 : index
    %39 = vector.load %arg2[%38, %c0_8] : memref<8x16xf32, #tpu.memory_space<vmem>>, vector<1x16xf32>
    %40 = vector.broadcast %39 : vector<1x16xf32> to vector<8x16xf32>
    %41 = arith.cmpf ole, %40, %0 : vector<8x16xf32>
    %42 = arith.extui %41 : vector<8x16xi1> to vector<8x16xi32>
    %43 = arith.addi %37, %42 : vector<8x16xi32>
    %c7_i32 = arith.constant 7 : i32
    %44 = arith.index_cast %c7_i32 : i32 to index
    %c0_9 = arith.constant 0 : index
    %45 = vector.load %arg2[%44, %c0_9] : memref<8x16xf32, #tpu.memory_space<vmem>>, vector<1x16xf32>
    %46 = vector.broadcast %45 : vector<1x16xf32> to vector<8x16xf32>
    %47 = arith.cmpf ole, %46, %0 : vector<8x16xf32>
    %48 = arith.extui %47 : vector<8x16xi1> to vector<8x16xi32>
    %49 = arith.addi %43, %48 : vector<8x16xi32>
    %c8_i32 = arith.constant 8 : i32
    %c5_i32_10 = arith.constant 5 : i32
    %50 = vector.broadcast %c5_i32_10 : i32 to vector<8x16xi32>
    %51 = arith.cmpi sge, %49, %50 : vector<8x16xi32>
    %cst = arith.constant 0x7F800000 : f32
    %52 = vector.broadcast %cst : f32 to vector<8x16xf32>
    %53 = arith.select %51, %0, %52 : vector<8x16xi1>, vector<8x16xf32>
    %cst_11 = arith.constant dense<0x7F800000> : vector<16xf32>
    %54 = vector.multi_reduction <minimumf>, %53, %cst_11 [0] : vector<8x16xf32> to vector<16xf32>
    %55 = vector.shape_cast %54 : vector<16xf32> to vector<1x16xf32>
    %c0_12 = arith.constant 0 : index
    %56 = memref.load %arg1[%c0_12] : memref<1xi32, #tpu.memory_space<smem>>
    %57 = arith.sitofp %56 : i32 to f32
    %c0_13 = arith.constant 0 : index
    %c0_14 = arith.constant 0 : index
    %58 = vector.load %arg3[%c0_13, %c0_14] : memref<1x16xf32, #tpu.memory_space<vmem>>, vector<1x16xf32>
    %59 = vector.broadcast %57 : f32 to vector<1x16xf32>
    %60 = arith.mulf %58, %59 : vector<1x16xf32>
    %61 = arith.addf %60, %55 : vector<1x16xf32>
    %cst_15 = arith.constant 1.000000e+00 : f32
    %62 = arith.addf %57, %cst_15 : f32
    %63 = vector.broadcast %62 : f32 to vector<1x16xf32>
    %64 = arith.divf %61, %63 : vector<1x16xf32>
    %c0_16 = arith.constant 0 : index
    %c0_17 = arith.constant 0 : index
    %65 = vector.load %arg5[%c0_16, %c0_17] : memref<1x16xf32, #tpu.memory_space<vmem>>, vector<1x16xf32>
    tpu.vector_store %arg5[%c0_16, %c0_17], %64 {strides = array<i32>} : memref<1x16xf32, #tpu.memory_space<vmem>>, vector<1x16xf32>,
    %66 = vector.broadcast %64 : vector<1x16xf32> to vector<8x16xf32>
    %67 = arith.subf %0, %66 : vector<8x16xf32>
    %c0_18 = arith.constant 0 : index
    %c0_19 = arith.constant 0 : index
    %68 = vector.load %arg4[%c0_18, %c0_19] : memref<8x16xf32, #tpu.memory_space<vmem>>, vector<8x16xf32>
    tpu.vector_store %arg4[%c0_18, %c0_19], %67 {strides = array<i32>} : memref<8x16xf32, #tpu.memory_space<vmem>>, vector<8x16xf32>,
    return
  }
  func.func @transform_0(%arg0: i32, %arg1: memref<1xi32, #tpu.memory_space<smem>>) -> (i32, i32) {
    %c0_i32 = arith.constant 0 : i32
    %c0_i32_0 = arith.constant 0 : i32
    return %c0_i32, %arg0 : i32, i32
  }
  func.func @transform_1(%arg0: i32, %arg1: memref<1xi32, #tpu.memory_space<smem>>) -> (i32, i32) {
    %c0_i32 = arith.constant 0 : i32
    %c0_i32_0 = arith.constant 0 : i32
    return %c0_i32, %arg0 : i32, i32
  }
  func.func @transform_2(%arg0: i32, %arg1: memref<1xi32, #tpu.memory_space<smem>>) -> (i32, i32) {
    %c0_i32 = arith.constant 0 : i32
    %c0_i32_0 = arith.constant 0 : i32
    return %c0_i32, %arg0 : i32, i32
  }
  func.func @transform_3(%arg0: i32, %arg1: memref<1xi32, #tpu.memory_space<smem>>) -> (i32, i32) {
    %c0_i32 = arith.constant 0 : i32
    %c0_i32_0 = arith.constant 0 : i32
    return %c0_i32, %arg0 : i32, i32
  }
}

</mosaic_0001>

<bundles_post_ra>
// kernel: tpu_custom_call.1
= control target key start
LH: loop header
LB: loop body
LE: loop exit
PB: predicated region body
PF: predicated region fallthrough
CT: control target
= control target key end

     0   :  { %11 = vsyncpa [#allocation5], 0  ;;  %s290_s0 = inlined_call_operand.<no memory space> [shape: s32[1], index: 0, kind: input, shape index: {}]   ;;  %s291_s1 = inlined_call_operand.hbm [shape: f32[8,16], index: 1, kind: input, shape index: {}]   ;;  %s292_s2 = inlined_call_operand.vmem [shape: f32[1,16], index: 2, kind: input, shape index: {}]   ;;  %s293_s3 = inlined_call_operand.hbm [shape: f32[8,16], index: 3, kind: output, shape index: {0}]   ;;  %s294_s4 = inlined_call_operand.hbm [shape: f32[1,16], index: 4, kind: output, shape index: {1}]  }
   0x1   :  { %12 = vsyncpa [#allocation6], 0 }
   0x2   :  { %13 = vsyncpa [#allocation9], 0  ;;  %s232_s15 = smov [#allocation4]  }
   0x3   :  { %s20_s16 = sshll.u32 %s232_s15, 4  ;;  %s21_s16 = int_to_ptr.vmem [resolvable:$true] %s20_s16 }
   0x4   :  { %s174_s17 = scalar_lea.vmem %s21_s16, 128  ;;  %p179_p1 = scmp.lt.s32.totalorder %s21_s16, %s21_s16 }
   0x5   :  { %p175_p0 = scmp.ne.s32.totalorder %s21_s16, %s174_s17  ;;  %p180_p2 = scmp.lt.s32.totalorder %s174_s17, %s174_s17 }
   0x7   :  { %p181_p3 = por %p180_p2, %p179_p1 }
   0x9   :  { %p182_p4 = pnand %p181_p3, %p175_p0 }
   0xb   :  { %185 = shalt.err (!%p182_p4)
}
   0xc   :  { %23 = dma.hbm_to_vmem [thread:$0]  %s291_s1, 128, %s21_s16, [#allocation5]  }
   0xd   :  { %226 = dma.done.wait [#allocation5], 128  }
   0xe   :  { %227 = vsyncadd [#allocation5], 4294967168  ;;  %v264_v0 = vld [vmem:[#allocation4] sm:$0xff]  ;;  %v233_v6 = vmov 0   ;;  %s104_s21 = scvt.s32.f32 %s290_s0  ;;  %vm95_vm8 = vcmask 130048   ;;  %v116_v31 = vlaneseq  ;;  %s234_s24 = smov [#allocation8]  }
   0xf   :  { %v152_v1 = vld [vmem:[#allocation4] ss:$0 sm:$0xff]  ;;  %v153_v2 = vld [vmem:[#allocation4 + $0x1] ss:$0 sm:$0xff]  ;;  %v154_v3 = vld [vmem:[#allocation4 + $0x2] ss:$0 sm:$0xff] }
  0x10   :  { %vm35_vm0 = vcmp.le.f32.partialorder %v152_v1, %v264_v0  ;;  %vm42_vm1 = vcmp.le.f32.partialorder %v153_v2, %v264_v0  ;;  %v155_v4 = vld [vmem:[#allocation4 + $0x3] ss:$0 sm:$0xff]  ;;  %v156_v5 = vld [vmem:[#allocation4 + $0x4] ss:$0 sm:$0xff]  ;;  %vm50_vm2 = vcmp.le.f32.partialorder %v154_v3, %v264_v0  ;;  %v157_v9 = vld [vmem:[#allocation4 + $0x5] ss:$0 sm:$0xff]  ;;  %v106_v33 = vstv %s104_s21 }
  0x11   :  { %v36_v7 = vsel %vm35_vm0, 1, %v233_v6  ;;  %v43_v8 = vsel %vm42_vm1, 1, %v233_v6  ;;  %vm58_vm3 = vcmp.le.f32.partialorder %v155_v4, %v264_v0  ;;  %v51_v11 = vsel %vm50_vm2, 1, %v233_v6  ;;  %v158_v13 = vld [vmem:[#allocation4 + $0x6] ss:$0 sm:$0xff]  ;;  %s109_s22 = sadd.f32 1.0, %s104_s21 }
  0x12   :  { %v44_v10 = vadd.s32 %v43_v8, %v36_v7  ;;  %vm66_vm4 = vcmp.le.f32.partialorder %v156_v5, %v264_v0  ;;  %v59_v12 = vsel %vm58_vm3, 1, %v233_v6  ;;  %vm74_vm5 = vcmp.le.f32.partialorder %v157_v9, %v264_v0  ;;  %v159_v16 = vld [vmem:[#allocation4 + $0x7] ss:$0 sm:$0xff]  ;;  %v105_v32 = vld [vmem:[%s292_s2] sm:$0x1]  ;;  %s139_s25 = sshll.u32 %s234_s24, 4  ;;  %s140_s25 = int_to_ptr.vmem [resolvable:$true] %s139_s25 }
  0x13   :  { %v67_v15 = vsel %vm66_vm4, 1, %v233_v6  ;;  %vm82_vm6 = vcmp.le.f32.partialorder %v158_v13, %v264_v0  ;;  %v75_v18 = vsel %vm74_vm5, 1, %v233_v6  ;;  %vm90_vm7 = vcmp.le.f32.partialorder %v159_v16, %v264_v0  ;;  %s235_s26 = smov [#allocation7]   ;;  %s186_s28 = scalar_lea.vmem %s140_s25, 16 }
  0x14   :  { %v52_v14 = vadd.s32 %v51_v11, %v44_v10  ;;  %v83_v20 = vsel %vm82_vm6, 1, %v233_v6  ;;  %v91_v22 = vsel %vm90_vm7, 1, %v233_v6  ;;  %v110_v25 = vstv %s109_s22  ;;  %s129_s27 = sshll.u32 %s235_s26, 4  ;;  %p187_p5 = scmp.ne.s32.totalorder %s140_s25, %s186_s28  ;;  %s130_s27 = int_to_ptr.vmem [resolvable:$true] %s129_s27 }
  0x15   :  { %164 = vrcp.f32 %v110_v25  ;;  %v107_v36 = vmul.f32 %v106_v33, %v105_v32  ;;  %v117_v37 = vshrl.u32 %v116_v31, 7  ;;  %vm113_vm10 = vcmask 122880   ;;  %s190_s2 = scalar_lea.vmem %s140_s25, 32  ;;  %p191_p6 = scmp.lt.s32.totalorder %s140_s25, %s140_s25 }
  0x16   :  { %v60_v17 = vadd.s32 %v59_v12, %v52_v14  ;;  %p192_p7 = scmp.lt.s32.totalorder %s190_s2, %s186_s28 }
  0x17   :  { %v118_v41 = vsub.s32 0, %v117_v37 }
  0x18   :  { %v68_v19 = vadd.s32 %v67_v15, %v60_v17  ;;  %p193_p8 = por %p192_p7, %p191_p6 }
  0x1a   :  { %v76_v21 = vadd.s32 %v75_v18, %v68_v19  ;;  %p194_p9 = pnand %p193_p8, %p187_p5 }
  0x1c   :  { %v84_v23 = vadd.s32 %v83_v20, %v76_v21 }
  0x1e   :  { %v92_v24 = vadd.s32 %v91_v22, %v84_v23 }
  0x20   :  { %vm93_vm9 = vcmp.ge.s32.totalorder %v92_v24, 5 }
  0x21   :  { %v94_v26 = vsel %vm93_vm9, %v264_v0, inf }
  0x22   :  { %v96_v27 = vsel %vm95_vm8, %v94_v26, inf  ;;  %v165_v39 = vpop.eup %164 }
  0x23   :  { %v97_v28 = vrot.slane %v96_v27, 4 }
  0x25   :  { %v98_v29 = vmin.f32 %v96_v27, %v97_v28 }
  0x27   :  { %v99_v30 = vrot.slane %v98_v29, 2 }
  0x29   :  { %v100_v34 = vmin.f32 %v98_v29, %v99_v30 }
  0x2b   :  { %v101_v35 = vrot.slane %v100_v34, 1 }
  0x2d   :  { %v102_v38 = vmin.f32 %v100_v34, %v101_v35 }
  0x2f   :  { %v108_v40 = vadd.f32 %v107_v36, %v102_v38 }
  0x31   :  { %v112_v42 = vmul.f32 %v165_v39, %v108_v40 }
  0x33   :  { %114 = vst.msk [vmem:[#allocation8] sm:$0x1] %vm113_vm10, %v112_v42  ;;  %v119_v43 = vrot.slane %v112_v42, %v118_v41 }
  0x34   :  { %197 = shalt.err (!%p194_p9)
}
  0x35   :  { %142 = dma.vmem_to_hbm [thread:$0]  %s140_s25, 16, %s294_s4, [#allocation9]   ;;  %v121_v44 = vsub.f32 %v264_v0, %v119_v43 }
  0x36   :  { %s206_s5 = scalar_lea.vmem %s130_s27, 128  ;;  %p211_p11 = scmp.lt.s32.totalorder %s130_s27, %s130_s27 }
  0x37   :  { %122 = vst.msk [vmem:[#allocation7] sm:$0xff] %vm95_vm8, %v121_v44  ;;  %p207_p10 = scmp.ne.s32.totalorder %s130_s27, %s206_s5  ;;  %p212_p12 = scmp.lt.s32.totalorder %s206_s5, %s206_s5 }
  0x39   :  { %p213_p13 = por %p212_p12, %p211_p11 }
  0x3b   :  { %p214_p0 = pnand %p213_p13, %p207_p10 }
  0x3d   :  { %217 = shalt.err (!%p214_p0)
}
  0x3e   :  { %132 = dma.vmem_to_hbm [thread:$0]  %s130_s27, 128, %s293_s3, [#allocation6]  }
  0x3f   :  { %228 = dma.done.wait [#allocation6], 128  }
  0x40   :  { %229 = vsyncadd [#allocation6], 4294967168 }
  0x41   :  { %230 = dma.done.wait [#allocation9], 16  }
  0x42   :  { %231 = vsyncadd [#allocation9], 4294967280 }
  0x43   :  { %149 = vsyncpa [#allocation5], 1 }
  0x44   :  { %150 = vsyncpa [#allocation6], 1 }
  0x45   :  { %151 = vsyncpa [#allocation9], 1 }

</bundles_post_ra>
